<compile_context>
chip_gen: v6e
topology: v6e:2x2x1
jax: 0.10.0
libtpu: 0.0.40
codegen_flags: <defaults>
</compile_context>

<pallas_src>
from functools import partial

import numpy as np
import jax
import jax.numpy as jnp
from jax.experimental import pallas as pl
from jax.experimental.pallas import tpu as pltpu
from scipy.optimize import linear_sum_assignment

EPS = 1e-8


def _round_up(x, m):
    return -(-x // m) * m


# ----------------------------- Pallas kernel --------------------------------
def _seg_stats_kernel(preds_ref, tgt_ref, inter_ref):
    # preds_ref : (1, K, TN) f32   tgt_ref : (1, 1, TN) i32
    # inter_ref : (1, K, C) f32    -- resident accumulator across the N grid axis
    @pl.when(pl.program_id(1) == 0)
    def _():
        inter_ref[...] = jnp.zeros_like(inter_ref)

    p = preds_ref[0]                      # (K, TN)  pixels on lanes
    t = tgt_ref[0]                        # (1, TN)
    K, TN = p.shape
    C = inter_ref.shape[-1]

    # one-hot of argmax over K (first-max tie-break, same as torch/np argmax)
    kidx = jax.lax.broadcasted_iota(jnp.int32, (K, TN), 0)
    pmax = jnp.max(p, axis=0, keepdims=True)                       # (1, TN)
    first_idx = jnp.min(jnp.where(p >= pmax, kidx, K), axis=0, keepdims=True)
    # bool -> f32 -> bf16 (two-step cast is exact for 0/1 and lowers on all gens)
    oh_pred = (kidx == first_idx).astype(jnp.float32).astype(jnp.bfloat16)

    # one-hot of ground-truth index mask over [0, C); out-of-range (incl. the
    # -1 pad sentinel) becomes an all-zero column and contributes nothing.
    cidx = jax.lax.broadcasted_iota(jnp.int32, (C, TN), 0)
    oh_gt = (t == cidx).astype(jnp.float32).astype(jnp.bfloat16)   # (C, TN)

    dn = (((1,), (1,)), ((), ()))  # contract over the pixel axis
    inter_ref[0] += jax.lax.dot_general(
        oh_pred, oh_gt, dn, preferred_element_type=jnp.float32)    # (K, C)


def _choose_tile_n(K, C, N):
    """Largest lane tile that keeps the pipeline comfortably inside VMEM."""
    K8 = _round_up(K, 8)
    C8 = _round_up(C, 8)
    # rough per-pixel VMEM bytes: double-buffered preds(f32) + targets(i32),
    # bf16 one-hot temps, f32 iota/compare temps.
    per_px = 4 * (2 * K8 + 2 * 8) + 2 * (K8 + C8) + 4 * (2 * K8 + C8)
    budget = 10 * 1024 * 1024           # safe under v5e's 16 MiB scoped default
    tile = (budget // per_px) // 128 * 128
    tile = max(128, min(tile, 32768))
    return min(tile, _round_up(N, 128))


def seg_stats_pallas(preds_bkn, targets_bn, num_classes):
    """preds_bkn: (B, K, N) f32 channels-first, targets_bn: (B, N) int.
    Returns the contingency table `inter` of shape (B, K, num_classes) f32
    where inter[b, k, c] = #pixels with argmax==k and gt==c."""
    B, K, N = preds_bkn.shape
    C = num_classes

    tile_n = _choose_tile_n(K, C, N)
    n_pad = _round_up(N, tile_n)
    if n_pad != N:
        # pad pixels get gt = -1 -> zero gt one-hot -> zero contribution.
        preds_bkn = jnp.pad(preds_bkn, ((0, 0), (0, 0), (0, n_pad - N)))
        targets_bn = jnp.pad(targets_bn, ((0, 0), (0, n_pad - N)),
                             constant_values=-1)
    tgt3 = targets_bn.reshape(B, 1, n_pad).astype(jnp.int32)

    grid_spec = pltpu.PrefetchScalarGridSpec(
        num_scalar_prefetch=0,
        grid=(B, n_pad // tile_n),
        in_specs=[
            pl.BlockSpec((1, K, tile_n), lambda b, n: (b, 0, n)),
            pl.BlockSpec((1, 1, tile_n), lambda b, n: (b, 0, n)),
        ],
        out_specs=pl.BlockSpec((1, K, C), lambda b, n: (b, 0, 0)),
    )
    return pl.pallas_call(
        _seg_stats_kernel,
        out_shape=jax.ShapeDtypeStruct((B, K, C), jnp.float32),
        grid_spec=grid_spec,
        compiler_params=pltpu.CompilerParams(
            dimension_semantics=("parallel", "arbitrary"),
            vmem_limit_bytes=32 * 1024 * 1024,
        ),
    )(preds_bkn.astype(jnp.float32), tgt3)


@partial(jax.jit, static_argnames=("num_classes", "channels_first"))
def seg_contingency(preds, targets, *, num_classes, channels_first=False):
    """preds: (B, N, K) (PyTorch convention) or (B, K, N) if channels_first."""
    if not channels_first:
        # Layout glue fused under the same jit; producers that can emit
        # channels-first should pass channels_first=True and skip this copy.
        preds = jnp.transpose(preds, (0, 2, 1))
    return seg_stats_pallas(preds, targets, num_classes)


# --------------------------- host-side scalar math ---------------------------
def _ari_from_contingency(nij):
    """Adjusted Rand Index from a contingency table (exact small-count math)."""
    nij = np.asarray(nij, dtype=np.float64)
    n = nij.sum()
    comb_n = n * (n - 1.0) / 2.0
    if comb_n == 0.0:
        return 1.0  # degenerate (<=1 sample): both partitions trivially identical
    a = nij.sum(axis=1)
    b = nij.sum(axis=0)
    sum_comb_c = (nij * (nij - 1.0) / 2.0).sum()
    sum_comb_a = (a * (a - 1.0) / 2.0).sum()
    sum_comb_b = (b * (b - 1.0) / 2.0).sum()
    expected = sum_comb_a * sum_comb_b / comb_n
    max_index = 0.5 * (sum_comb_a + sum_comb_b)
    denom = max_index - expected
    if denom == 0.0:
        return 1.0
    return float((sum_comb_c - expected) / denom)


def _hiou_from_tables(inter_i):
    """Hungarian-matched IoU from one (K, C) intersection table."""
    I = np.asarray(inter_i, dtype=np.float64)
    psum = I.sum(axis=1)                     # pred mask sizes
    gsum = I.sum(axis=0)                     # gt class sizes
    present = np.where(gsum > 0)[0]          # sorted present classes (torch.unique)
    union = psum[:, None] + gsum[None, :] - I
    iou = I / (union + EPS)
    iou_p = iou[:, present]                  # (K, Kt)
    cost = 1.0 - iou_p                       # iou_loss
    # TODO(synk): linear_sum_assignment (Hungarian) has no Pallas equivalent; done on host.
    r, c = linear_sum_assignment(cost)
    return float(iou_p[r, c].mean())


class SegMetricsPallas:
    """JAX/Pallas port of SegMetrics(metrics=['hiou','ari','ari_fg'])."""

    def __init__(self, metrics=("hiou", "ari", "ari_fg"), num_classes=5):
        self.metrics = list(metrics)
        self.num_classes = num_classes

    def __call__(self, preds, targets):
        """
        preds  : (B, N, K) float  — per-pixel slot logits
        targets: (B, N)    int    — index mask
        returns: dict of python-float metrics
        """
        preds = jnp.asarray(preds)
        targets = jnp.asarray(targets)
        valid = np.asarray(jnp.sum(targets, axis=-1) > 0)

        inter = np.asarray(jax.block_until_ready(
            seg_contingency(preds, targets, num_classes=self.num_classes)))

        out = {}
        if valid.sum() == 0:
            for m in self.metrics:
                out[m] = 1.0
            return out

        idxs = np.where(valid)[0]
        vals = {m: [] for m in self.metrics}
        for i in idxs:
            tab = inter[i]
            if "hiou" in vals:
                vals["hiou"].append(_hiou_from_tables(tab))
            if "ari" in vals:
                vals["ari"].append(_ari_from_contingency(tab))
            if "ari_fg" in vals:
                # fg contingency == full contingency with the bg (c=0) column zeroed
                tab_fg = tab.copy()
                tab_fg[:, 0] = 0.0
                vals["ari_fg"].append(_ari_from_contingency(tab_fg))
        for m in self.metrics:
            out[m] = float(np.mean(vals[m]))
        return out


# ----------------------------------- main ------------------------------------
if __name__ == "__main__":
    B, H, W, K, C = 2, 16, 16, 4, 5
    N = H * W

    key = jax.random.PRNGKey(0)
    kp, kt = jax.random.split(key)
    preds = jax.random.normal(kp, (B, N, K), dtype=jnp.float32)
    targets = jax.random.randint(kt, (B, N), 0, C, dtype=jnp.int32)

    seg = SegMetricsPallas(metrics=("hiou", "ari", "ari_fg"), num_classes=C)
    metrics = seg(preds, targets)

    # --------- sanity check: kernel contingency vs. pure-numpy reference ---------
    def np_contingency(preds_np, tgt_np, num_classes):
        B_, N_, K_ = preds_np.shape
        labels = preds_np.argmax(-1)
        ref = np.zeros((B_, K_, num_classes), np.float64)
        for i in range(B_):
            for n in range(N_):
                ref[i, labels[i, n], tgt_np[i, n]] += 1.0
        return ref

    inter = np.asarray(jax.block_until_ready(
        seg_contingency(preds, targets, num_classes=C)))
    ref = np_contingency(np.asarray(preds), np.asarray(targets), C)
    assert np.allclose(inter, ref), "contingency mismatch"
    ref_fg = ref.copy(); ref_fg[:, :, 0] = 0.0
    inter_fg = inter.copy(); inter_fg[:, :, 0] = 0.0
    assert np.allclose(inter_fg, ref_fg), "fg contingency mismatch"

    # ragged N (not a multiple of 128) exercises the pad-to-tile path
    N2 = 200
    preds2 = jax.random.normal(kp, (B, N2, K), dtype=jnp.float32)
    targets2 = jax.random.randint(kt, (B, N2), 0, C, dtype=jnp.int32)
    inter2 = np.asarray(jax.block_until_ready(
        seg_contingency(preds2, targets2, num_classes=C)))
    ref2 = np_contingency(np.asarray(preds2), np.asarray(targets2), C)
    assert np.allclose(inter2, ref2), "padded-N contingency mismatch"

    assert set(metrics.keys()) == {"hiou", "ari", "ari_fg"}
    assert all(np.isfinite(v) for v in metrics.values())
    print("KERNEL_OK")
</pallas_src>

<mosaic_0001>
module attributes {stable_mosaic.version = 11 : i64} {
  func.func @_seg_stats_kernel(%arg0: i32, %arg1: i32, %arg2: memref<1x4x256xf32, #tpu.memory_space<vmem>>, %arg3: memref<1x1x256xi32, #tpu.memory_space<vmem>>, %arg4: memref<1x4x5xf32, #tpu.memory_space<vmem>>) attributes {dimension_semantics = [#tpu.dimension_semantics<parallel>, #tpu.dimension_semantics<arbitrary>], iteration_bounds = array<i64: 2, 1>, scalar_prefetch = 0 : i64, scratch_operands = 0 : i64, tpu.core_type = #tpu.core_type<tc>, window_params = [{transform_indices = @transform_0, window_bounds = array<i64: 1, 4, 256>}, {transform_indices = @transform_1, window_bounds = array<i64: 1, 1, 256>}, {transform_indices = @transform_2, window_bounds = array<i64: 1, 4, 5>}]} {
    %c0_i32 = arith.constant 0 : i32
    %0 = arith.cmpi eq, %arg1, %c0_i32 : i32
    %1 = arith.extui %0 : i1 to i32
    %c0_i32_0 = arith.constant 0 : i32
    %2 = arith.cmpi ne, %1, %c0_i32_0 : i32
    scf.if %2 {
      %cst_14 = arith.constant 0.000000e+00 : f32
      %34 = vector.broadcast %cst_14 : f32 to vector<1x4x5xf32>
      %c0_15 = arith.constant 0 : index
      %c0_16 = arith.constant 0 : index
      %c0_17 = arith.constant 0 : index
      %35 = vector.load %arg4[%c0_15, %c0_16, %c0_17] : memref<1x4x5xf32, #tpu.memory_space<vmem>>, vector<1x4x5xf32>
      tpu.vector_store %arg4[%c0_15, %c0_16, %c0_17], %34 {strides = array<i32>} : memref<1x4x5xf32, #tpu.memory_space<vmem>>, vector<1x4x5xf32>,
    } else {
    }
    %c0 = arith.constant 0 : index
    %c0_1 = arith.constant 0 : index
    %c0_2 = arith.constant 0 : index
    %3 = vector.load %arg2[%c0, %c0_1, %c0_2] : memref<1x4x256xf32, #tpu.memory_space<vmem>>, vector<1x4x256xf32>
    %4 = vector.shape_cast %3 : vector<1x4x256xf32> to vector<4x256xf32>
    %c0_3 = arith.constant 0 : index
    %c0_4 = arith.constant 0 : index
    %c0_5 = arith.constant 0 : index
    %5 = vector.load %arg3[%c0_3, %c0_4, %c0_5] : memref<1x1x256xi32, #tpu.memory_space<vmem>>, vector<1x1x256xi32>
    %6 = vector.shape_cast %5 : vector<1x1x256xi32> to vector<1x256xi32>
    %7 = tpu.iota {dimensions = array<i32: 0>} : vector<4x256xi32>
    %cst = arith.constant dense<0xFF800000> : vector<256xf32>
    %8 = vector.multi_reduction <maximumf>, %4, %cst [0] : vector<4x256xf32> to vector<256xf32>
    %9 = vector.shape_cast %8 : vector<256xf32> to vector<1x256xf32>
    %10 = vector.broadcast %9 : vector<1x256xf32> to vector<4x256xf32>
    %11 = arith.cmpf oge, %4, %10 : vector<4x256xf32>
    %c4_i32 = arith.constant 4 : i32
    %12 = vector.broadcast %c4_i32 : i32 to vector<4x256xi32>
    %13 = arith.select %11, %7, %12 : vector<4x256xi1>, vector<4x256xi32>
    %cst_6 = arith.constant dense<2147483647> : vector<256xi32>
    %14 = vector.multi_reduction <minsi>, %13, %cst_6 [0] : vector<4x256xi32> to vector<256xi32>
    %15 = vector.shape_cast %14 : vector<256xi32> to vector<1x256xi32>
    %16 = vector.broadcast %15 : vector<1x256xi32> to vector<4x256xi32>
    %17 = arith.cmpi eq, %7, %16 : vector<4x256xi32>
    %18 = arith.extui %17 : vector<4x256xi1> to vector<4x256xi32>
    %19 = arith.sitofp %18 : vector<4x256xi32> to vector<4x256xf32>
    %20 = arith.truncf %19 : vector<4x256xf32> to vector<4x256xbf16>
    %21 = tpu.iota {dimensions = array<i32: 0>} : vector<5x256xi32>
    %22 = vector.broadcast %6 : vector<1x256xi32> to vector<5x256xi32>
    %23 = arith.cmpi eq, %22, %21 : vector<5x256xi32>
    %24 = arith.extui %23 : vector<5x256xi1> to vector<5x256xi32>
    %25 = arith.sitofp %24 : vector<5x256xi32> to vector<5x256xf32>
    %26 = arith.truncf %25 : vector<5x256xf32> to vector<5x256xbf16>
    %c0_7 = arith.constant 0 : index
    %c0_8 = arith.constant 0 : index
    %c0_9 = arith.constant 0 : index
    %27 = vector.load %arg4[%c0_7, %c0_8, %c0_9] : memref<1x4x5xf32, #tpu.memory_space<vmem>>, vector<1x4x5xf32>
    %28 = vector.shape_cast %27 : vector<1x4x5xf32> to vector<4x5xf32>
    %cst_10 = arith.constant dense<0.000000e+00> : vector<4x5xf32>
    %29 = tpu.matmul %20, %26, %cst_10 {dimension_numbers = #tpu.dot_dimension_numbers<[1], [1], [0], [0], [0, 0, 1, 0], [], []>} : vector<4x256xbf16>, vector<5x256xbf16>, vector<4x5xf32> -> vector<4x5xf32>
    %30 = arith.addf %28, %29 : vector<4x5xf32>
    %c0_11 = arith.constant 0 : index
    %c0_12 = arith.constant 0 : index
    %c0_13 = arith.constant 0 : index
    %31 = vector.load %arg4[%c0_11, %c0_12, %c0_13] : memref<1x4x5xf32, #tpu.memory_space<vmem>>, vector<1x4x5xf32>
    %32 = vector.shape_cast %31 : vector<1x4x5xf32> to vector<4x5xf32>
    %33 = vector.shape_cast %30 : vector<4x5xf32> to vector<1x4x5xf32>
    tpu.vector_store %arg4[%c0_11, %c0_12, %c0_13], %33 {strides = array<i32>} : memref<1x4x5xf32, #tpu.memory_space<vmem>>, vector<1x4x5xf32>,
    return
  }
  func.func @transform_0(%arg0: i32, %arg1: i32) -> (i32, i32, i32) {
    %c0_i32 = arith.constant 0 : i32
    %c0_i32_0 = arith.constant 0 : i32
    return %arg0, %c0_i32, %arg1 : i32, i32, i32
  }
  func.func @transform_1(%arg0: i32, %arg1: i32) -> (i32, i32, i32) {
    %c0_i32 = arith.constant 0 : i32
    %c0_i32_0 = arith.constant 0 : i32
    return %arg0, %c0_i32, %arg1 : i32, i32, i32
  }
  func.func @transform_2(%arg0: i32, %arg1: i32) -> (i32, i32, i32) {
    %c0_i32 = arith.constant 0 : i32
    %c0_i32_0 = arith.constant 0 : i32
    %c0_i32_1 = arith.constant 0 : i32
    return %arg0, %c0_i32, %c0_i32_0 : i32, i32, i32
  }
}

</mosaic_0001>

<bundles_post_ra>
// kernel: seg_contingency.1
= control target key start
LH: loop header
LB: loop body
LE: loop exit
PB: predicated region body
PF: predicated region fallthrough
CT: control target
= control target key end

     0   :  { %7 = vsyncpa [#allocation3], 0  ;;  %s849_s0 = inlined_call_operand.hbm [shape: f32[2,4,256], index: 0, kind: input, shape index: {}]   ;;  %s850_s1 = inlined_call_operand.vmem [shape: s32[2,1,256], index: 1, kind: input, shape index: {}]   ;;  %s851_s2 = inlined_call_operand.hbm [shape: f32[2,4,5], index: 2, kind: output, shape index: {}]  }
   0x1   :  { %9 = vsyncpa [#allocation3 + $0x1], 0 }
   0x2   :  { %10 = vsyncpa [#allocation4], 0 }
   0x3   :  { %12 = vsyncpa [#allocation4 + $0x1], 0  ;;  %s675_s9 = smov 0   ;;  %s677_s10 = smov 0  }
   0x4   :  { %s679_s11 = smov 0   ;;  %s681_s12 = smov 0  }
   0x5   :  { %s683_s13 = smov 0   ;;  %s685_s14 = smov 0  }
   0x6 LB: > { %s451_s15 = sadd.s32 4294967295, %s653_s14   ;;  %s452_s16 = sadd.s32 4294967294, %s653_s14   ;;  %s653_s14 = sphi %s685_s14, %s18_s14   ;;  %s649_s13 = sphi %s683_s13, %s863_s13   ;;  %s645_s12 = sphi %s681_s12, %s862_s12   ;;  %s641_s11 = sphi %s679_s11, %s861_s11   ;;  %s637_s10 = sphi %s677_s10, %s860_s10   ;;  %s633_s9 = sphi %s675_s9, %s859_s9  }
   0x7   : > { %s30_s17 = sadd.s32 1, %s649_s13  ;;  %s39_s18 = sadd.s32 1, %s641_s11 }
   0x8   : > { %p32_p0 = scmp.ge.s32.totalorder %s30_s17, 2  ;;  %p46_p1 = scmp.ne.s32.totalorder %s641_s11, %s637_s10 }
   0x9   : > { %p47_p2 = scmp.eq.s32.totalorder %s653_s14, 0  ;;  %p52_p3 = scmp.ne.s32.totalorder %s637_s10, %s633_s9 }
   0xa   : > { %s865_s17 = smov (%p32_p0, %s30_s17), 0  ;;  %p53_p5 = scmp.eq.s32.totalorder %s451_s15, 0 }
   0xb   : > { %p716_p4 = por %p47_p2, %p46_p1  ;;  %s34_s20 = ssub.s32 %s649_s13, %s865_s17 }
   0xc   : > { %p104_p6 = scmp.eq.s32.totalorder %s451_s15, 1  ;;  %p37_p7 = scmp.eq.s32.totalorder %s34_s20, 0 }
   0xd   : > { %p722_p8 = por %p53_p5, %p52_p3  ;;  %p110_p10 = scmp.eq.s32.totalorder %s452_s16, 1 }
   0xe   : > { %p726_p9 = por %p104_p6, %p46_p1  ;;  %p491_p13 = scmp.lt.s32.totalorder %s653_s14, 2 }
   0xf   : > { %s731_s23 = scalar_select %p37_p7, %s641_s11, %s39_s18  }
  0x10   : > { %p733_p11 = por %p110_p10, %p52_p3  ;;  %s130_s25 = sand.u32 1, %s641_s11  }
  0x11   : > { %s455_s26 = sshll.u32 %s130_s25, 3  ;;  %s478_s27 = sshll.u32 %s649_s13, 7 }
  0x12   : > { %s855_s24 = scalar_select %p733_p11, 1, 0 }
  0x13   : > { %s142_s30 = scalar_lea.hbm %s849_s0, %s478_s27  ;;  %s134_s3 = scalar_lea.vmem [#allocation2], %s455_s26 }
  0x14   : > { %s144_s4 = sshll.u32 %s134_s3, 4  ;;  %p746_p0 = pnand %p491_p13, %p716_p4  ;;  %s145_s4 = int_to_ptr.vmem [resolvable:$true] %s144_s4 }
  0x15   : > { %p458_p1 = scmp.ge.s32.totalorder %s653_s14, 1  ;;  %p161_p2 = scmp.lt.s32.totalorder %s653_s14, 3 }
  0x16   : > { %s131_s6 = scalar_lea.sflag [#allocation3], %s130_s25  ;;  %p547_p3 = pneg %p746_p0 }
  0x17   : > { %s558_s7 = scalar_lea.vmem %s145_s4, 128  ;;  %s655_s8 = smov [#allocation2]  }
  0x18   : > { %p559_p5 = scmp.ne.s32.totalorder %s145_s4, %s558_s7  ;;  %s563_s15 = sshll.u32 %s655_s8, 4  ;;  %s564_s15 = int_to_ptr.vmem [resolvable:$false] %s563_s15 }
  0x19   : > { %s565_s16 = scalar_lea.vmem %s564_s15, 256  ;;  %p566_p10 = scmp.lt.s32.totalorder %s145_s4, %s564_s15 }
  0x1a   : > { %p561_p6 = pnand %p559_p5, %p547_p3  ;;  %p567_p12 = scmp.lt.s32.totalorder %s565_s16, %s558_s7 }
  0x1c   : > { %p562_p7 = pneg %p561_p6  ;;  %p568_p4 = por %p567_p12, %p566_p10 }
  0x1e   : > { %p569_p13 = pnand %p568_p4, %p562_p7 }
  0x20   : > { %572 = shalt.err (!%p569_p13)
}
  0x21   : > { %486 = dma.hbm_to_vmem [thread:$0]  (!%p746_p0), %s142_s30, 128, %s145_s4, %s131_s6  }
  0x22   : > { %p162_p11 = pnand %p458_p1, %p161_p2 }
  0x23   : > { %s761_s18 = sand.u32 (!%p162_p11), 1, %s637_s10  }
  0x24   : > { %165 = sbr.rel (%p162_p11) target bundleno = 290 (0x122), region = 28  ;;  %s459_s19 = sshll.u32 (!%p162_p11), %s761_s18, 3 }
  0x25   : > { %s168_s20 = scalar_lea.sflag (!%p162_p11), [#allocation3], %s761_s18  ;;  %s171_s25 = scalar_lea.vmem (!%p162_p11), [#allocation2], %s459_s19 }
  0x29   : > { %624 = dma.done.wait (%p722_p8), %s168_s20, 128  }
  0x2a   : > { %626 = vsyncadd (%p722_p8), %s168_s20, 4294967168  ;;  %p202_p12 = scmp.lt.s32.totalorder %s645_s12, 1  ;;  %v219_v0 = vlaneseq  ;;  %s460_s26 = sshll.u32 %s761_s18, 2  ;;  %vm215_vm0 = vcmask 35840   ;;  %v656_v2 = vmov 0.0   ;;  %vm224_vm1 = vcmask 1043456  }
  0x2b   : > { %s774_s28 = scalar_lea.vmem [#allocation5], %s460_s26  ;;  %v217_v6 = vld [vmem:[%s171_s25] sm:$0xff]  ;;  %v657_v13 = vmov 839922192   ;;  %v658_v17 = vmov 1.0|1.0  }
  0x2c   : > { %s203_s27 = scalar_select %p202_p12, %s645_s12, 1  ;;  %v772_v1 = vshrl.u32 %v219_v0, 7  ;;  %216 = vst.msk [vmem:[%s774_s28] sm:$0xf] %vm215_vm0, %v656_v2  ;;  %v222_v9 = vcombine.high %v217_v6, %v217_v6  ;;  %v225_v10 = vsel %vm224_vm1, %v217_v6, -inf  ;;  %v245_v14 = vunpack.c.l.s4 %v657_v13 }
  0x2d   : > { %v226_v11 = vrot.slane %v225_v10, 4  ;;  %s475_s4 = sshll.u32 %s645_s12, 6  ;;  %s355_s5 = sshll.u32 %s774_s28, 4  ;;  %s801_s5 = int_to_ptr.vmem [resolvable:$true] %s355_s5 }
  0x2e   : > { %s461_s29 = sshll.u32 %s203_s27, 1  ;;  %v287_v3 = vsub.s32 1, %v772_v1  ;;  %v283_v4 = vsub.s32 0, %v772_v1  ;;  %v232_v12 = vsel %vm224_vm1, %v222_v9, -inf  ;;  %v246_v20 = vunpack.c.0.s8 %v245_v14  ;;  %s799_s8 = scalar_lea.hbm %s851_s2, %s475_s4 }
  0x2f   : > { %s208_s3 = scalar_lea.vmem %s850_s1, %s461_s29  ;;  %v227_v15 = vmax.f32 %v225_v10, %v226_v11  ;;  %v233_v16 = vrot.slane %v232_v12, 4  ;;  %s342_s15 = scalar_lea.sflag [#allocation4], %s761_s18 }
  0x30   : > { %v218_v5 = vld [vmem:[%s208_s3] sm:$0x3]  ;;  %v249_v25 = vsub.s32 %v246_v20, %v772_v1  ;;  %s573_s16 = scalar_lea.vmem %s801_s5, 64  ;;  %s659_s12 = smov [#allocation5]  }
  0x31   : > { %v288_v7 = vrot.slane %v218_v5, %v287_v3  ;;  %v284_v8 = vrot.slane %v218_v5, %v283_v4  ;;  %v228_v18 = vrot.slane %v227_v15, 2  ;;  %v234_v19 = vmax.f32 %v232_v12, %v233_v16  ;;  %p574_p8 = scmp.ne.s32.totalorder %s801_s5, %s573_s16  ;;  %s577_s19 = sshll.u32 %s659_s12, 4  ;;  %s578_s19 = int_to_ptr.vmem [resolvable:$false] %s577_s19 }
  0x32   : > { %v250_v29 = vrot.slane %v772_v1, %v249_v25  ;;  %s579_s20 = scalar_lea.vmem %s578_s19, 128  ;;  %p580_p1 = scmp.lt.s32.totalorder %s801_s5, %s578_s19 }
  0x33   : > { %vm290_vm2 = vcmp.eq.s32.totalorder %v288_v7, %v772_v1  ;;  %vm289_vm3 = vcmp.eq.s32.totalorder %v284_v8, %v772_v1  ;;  %v229_v21 = vmax.f32 %v227_v15, %v228_v18  ;;  %v235_v22 = vrot.slane %v234_v19, 2  ;;  %v297_v47 = vld [vmem:[%s774_s28] sm:$0xf]  ;;  %p575_p11 = pnand %p574_p8, %p726_p9  ;;  %p581_p2 = scmp.lt.s32.totalorder %s579_s20, %s573_s16 }
  0x34   : > { %vm466_vm4 = vmpackc.low %vm290_vm2, %vm290_vm2 }
  0x35   : > { %467 = vmatprep.subr.msk.bf16.mxu0 %vm466_vm4, %v658_v17  ;;  %vm468_vm5 = vmpackc.low %vm289_vm3, %vm289_vm3  ;;  %v230_v23 = vrot.slane %v229_v21, 1  ;;  %v236_v24 = vmax.f32 %v234_v19, %v235_v22  ;;  %p576_p0 = pneg %p575_p11  ;;  %p582_p3 = por %p581_p2, %p580_p1 }
  0x36   : > { %469 = vmatpush1.bf16.xpose.msk.msra.mxu0 %vm468_vm5, %v658_v17 }
  0x37   : > { %v231_v26 = vmax.f32 %v229_v21, %v230_v23  ;;  %v237_v27 = vrot.slane %v236_v24, 1  ;;  %p583_p5 = pnand %p582_p3, %p576_p0 }
  0x39   : > { %v238_v28 = vmax.f32 %v236_v24, %v237_v27 }
  0x3b   : > { %v241_v30 = vcombine.low %v231_v26, %v238_v28 }
  0x3d   : > { %vm243_vm6 = vcmp.ge.f32.partialorder %v217_v6, %v241_v30 }
  0x3e   : > { %v251_v31 = vsel %vm243_vm6, %v250_v29, 4 }
  0x3f   : > { %v252_v32 = vcombine.high %v251_v31, %v251_v31  ;;  %v253_v33 = vsel %vm224_vm1, %v251_v31, 2147483647 }
  0x40   : > { %v254_v34 = vrot.slane %v253_v33, 4 }
  0x41   : > { %v263_v35 = vsel %vm224_vm1, %v252_v32, 2147483647 }
  0x42   : > { %v264_v36 = vrot.slane %v263_v35, 4  ;;  %vm255_vm7 = vcmp.lt.s32.totalorder %v253_v33, %v254_v34 }
  0x43   : > { %v256_v37 = vsel %vm255_vm7, %v253_v33, %v254_v34 }
  0x44   : > { %vm265_vm8 = vcmp.lt.s32.totalorder %v263_v35, %v264_v36  ;;  %v257_v38 = vrot.slane %v256_v37, 2 }
  0x45   : > { %v266_v39 = vsel %vm265_vm8, %v263_v35, %v264_v36 }
  0x46   : > { %v267_v40 = vrot.slane %v266_v39, 2  ;;  %vm258_vm9 = vcmp.lt.s32.totalorder %v256_v37, %v257_v38 }
  0x47   : > { %v259_v41 = vsel %vm258_vm9, %v256_v37, %v257_v38 }
  0x48   : > { %vm268_vm10 = vcmp.lt.s32.totalorder %v266_v39, %v267_v40  ;;  %v260_v42 = vrot.slane %v259_v41, 1 }
  0x49   : > { %v269_v43 = vsel %vm268_vm10, %v266_v39, %v267_v40 }
  0x4a   : > { %v270_v44 = vrot.slane %v269_v43, 1  ;;  %vm261_vm11 = vcmp.lt.s32.totalorder %v259_v41, %v260_v42 }
  0x4b   : > { %v262_v45 = vsel %vm261_vm11, %v259_v41, %v260_v42 }
  0x4c   : > { %vm271_vm12 = vcmp.lt.s32.totalorder %v269_v43, %v270_v44  ;;  %vm273_vm13 = vcmp.eq.s32.totalorder %v772_v1, %v262_v45 }
  0x4d   : > { %v272_v46 = vsel %vm271_vm12, %v269_v43, %v270_v44  ;;  %vm472_vm15 = vmpackc.low %vm273_vm13, %vm273_vm13 }
  0x4e   : > { %vm274_vm14 = vcmp.eq.s32.totalorder %v772_v1, %v272_v46 }
  0x4f   : > { %vm470_vm1 = vmpackc.low %vm274_vm14, %vm274_vm14 }
  0x50   : > { %471 = vmatprep.mubr.msk.bf16.mxu0 %vm470_vm1, %v658_v17 }
  0x51   : > { %473 = vmatmul.mubr.msk.bf16.vlgmr.msra.gmra.mxu0 %vm472_vm15, %v658_v17 }
 0x111   : > { %v332_v48 = vpop.f32.mrf.mxu0 }
 0x112   : > { %v338_v49 = vadd.f32 %v332_v48, %v297_v47 }
 0x113   : > { %v334_v50 = vpop.f32.mrf.mxu0 }
 0x114   : > { %340 = vst.msk [vmem:[%s774_s28] sm:$0xf] %vm215_vm0, %v338_v49 }
 0x115   : > { %v335_v51 = vpop.f32.mrf.mxu0 }
 0x116   : > { %586 = shalt.err (!%p583_p5)
}
 0x117   : > { %s587_s25 = scalar_lea.hbm %s799_s8, 64  ;;  %s591_s27 = scalar_lea.hbm %s851_s2, 128 }
 0x118   : > { %p588_p6 = scmp.ne.s32.totalorder %s799_s8, %s587_s25  ;;  %p592_p4 = scmp.lt.s32.totalorder %s799_s8, %s851_s2 }
 0x119   : > { %p593_p13 = scmp.lt.s32.totalorder %s591_s27, %s587_s25 }
 0x11a   : > { %p589_p7 = pnand %p588_p6, %p726_p9 }
 0x11b   : > { %p594_p12 = por %p593_p13, %p592_p4 }
 0x11c   : > { %p590_p10 = pneg %p589_p7 }
 0x11e   : > { %p595_p8 = pnand %p594_p12, %p590_p10 }
 0x120   : > { %598 = shalt.err (!%p595_p8)
}
 0x121   : > { %481 = dma.vmem_to_hbm [thread:$0]  (%p726_p9), %s801_s5, 64, %s799_s8, %s342_s15   ;;  %v336_v52 = vpop.f32.mrf.mxu0 }
 0x122 PF: > { %s367_s21 = sand.u32 1, %s633_s9   ;;  %p857_p11 = scmp.ne.s32.totalorder %s855_s24, 0 }
 0x123   : > { %p858_p0 = scmp.ge.s32.totalorder %s653_s14, 2  ;;  %s368_s30 = scalar_lea.sflag [#allocation4], %s367_s21 }
 0x125   : > { %p488_p1 = pnand %p858_p0, %p857_p11 }
 0x127   : > { %p489_p2 = pneg %p488_p1 }
 0x129   : > { %628 = dma.done.wait (%p489_p2), %s368_s30, 64  }
 0x12a   : > { %630 = vsyncadd (%p489_p2), %s368_s30, 4294967232  ;;  %s18_s14 = sadd.s32 1, %s653_s14   ;;  %s859_s9 = smov %s637_s10 }
 0x12b   : > { %p15_p3 = scmp.ge.s32.totalorder %s18_s14, 4   ;;  %s860_s10 = smov %s641_s11 }
 0x12c   : > { %s861_s11 = smov %s731_s23  ;;  %s862_s12 = smov %s649_s13 }
 0x12d   : > { %s863_s13 = smov %s865_s17  ;;  %17 = sbr.rel (!%p15_p3) target bundleno = 6 (0x6), region = 80 }
 0x132   :  { %373 = vsyncpa [#allocation3], 1 }
 0x133   :  { %375 = vsyncpa [#allocation3 + $0x1], 1 }
 0x134   :  { %376 = vsyncpa [#allocation4], 1 }
 0x135   :  { %378 = vsyncpa [#allocation4 + $0x1], 1 }

</bundles_post_ra>
